<compile_context>
chip_gen: v5e
topology: v5e:2x2
jax: 0.10.0
libtpu: 0.0.40
codegen_flags: <defaults>
</compile_context>

<pallas_src>
import jax
import jax.numpy as jnp
from jax.experimental import pallas as pl
from jax.experimental.pallas import tpu as pltpu


def _pick_tile(total, preferred, align):
    """Largest multiple of `align` that divides `total` and is <= preferred."""
    if total <= preferred:
        return total
    t = (preferred // align) * align
    while t >= align:
        if total % t == 0:
            return t
        t -= align
    return total


def _expert_mlp_kernel(order_ref, nact_ref,                 # scalar prefetch (SMEM)
                       h_ref, g_ref, u_ref, d_ref, w_ref,   # VMEM input blocks
                       o_ref,                               # VMEM output block
                       acc_ref):                            # f32 accumulator scratch
    t = pl.program_id(0)
    e = pl.program_id(1)
    i = pl.program_id(2)
    n_e = pl.num_programs(1)
    n_i = pl.num_programs(2)

    @pl.when((e == 0) & (i == 0))
    def _init():
        acc_ref[...] = jnp.zeros_like(acc_ref)

    # Skip experts that received no tokens in this token tile (the expert axis is
    # compacted: active experts first).  Weight DMAs for skipped steps are elided
    # by the index_maps (frozen block index), so this also saves HBM traffic.
    @pl.when(e < nact_ref[t])
    def _compute():
        h = h_ref[...]                                                   # (tT, H)
        gate = jnp.dot(h, g_ref[0], preferred_element_type=jnp.float32)  # (tT, tI)
        up = jnp.dot(h, u_ref[0], preferred_element_type=jnp.float32)    # (tT, tI)
        act = jax.nn.silu(gate) * up                                     # (tT, tI) f32
        act = act * w_ref[0]               # routing weight on the smaller operand
        acc_ref[...] += jnp.dot(act.astype(d_ref.dtype), d_ref[0],
                                preferred_element_type=jnp.float32)      # (tT, H)

    @pl.when((e == n_e - 1) & (i == n_i - 1))
    def _flush():
        o_ref[...] = acc_ref[...].astype(o_ref.dtype)


def expert_mlp_pallas(hidden_states, gate_w, up_w, down_w, token_expert_weights,
                      expert_order, num_active, *, tT, tI, top_k=None):
    """hidden_states: (T, H); gate_w/up_w: (E, H, I); down_w: (E, I, H);
    token_expert_weights: (E, T, 1) f32 dense routing weights (0 for unselected);
    expert_order: (T//tT, E) int32 per-tile expert permutation (active first);
    num_active:   (T//tT,)  int32 number of active experts per token tile (>= 1).
    """
    T, H = hidden_states.shape
    E, _, I = gate_w.shape
    assert T % tT == 0 and I % tI == 0
    assert tT % 8 == 0 or tT == T
    assert tI % 128 == 0 or tI == I
    n_t = T // tT
    n_i = I // tI

    # ---- index maps (receive the scalar-prefetch refs as trailing args) ----
    def _h_map(t, e, i, order, nact):
        return (t, 0)

    def _gu_map(t, e, i, order, nact):
        active = e < nact[t]
        ee = order[t, jnp.minimum(e, nact[t] - 1)]
        ii = jnp.where(active, i, n_i - 1)     # frozen on skipped steps -> no DMA
        return (ee, 0, ii)

    def _d_map(t, e, i, order, nact):
        active = e < nact[t]
        ee = order[t, jnp.minimum(e, nact[t] - 1)]
        ii = jnp.where(active, i, n_i - 1)
        return (ee, ii, 0)

    def _w_map(t, e, i, order, nact):
        ee = order[t, jnp.minimum(e, nact[t] - 1)]
        return (ee, t, 0)

    def _o_map(t, e, i, order, nact):
        return (t, 0)

    # ---- VMEM budget: double-buffered blocks + resident f32 accumulator ----
    h_item = hidden_states.dtype.itemsize
    w_item = gate_w.dtype.itemsize
    per_step = (tT * H * h_item            # hidden token tile
                + 2 * H * tI * w_item      # gate + up weight chunks
                + tI * H * w_item          # down weight chunk
                + tT * 4                   # routing-weight column (f32)
                + tT * H * h_item)         # output tile
    vmem_needed = 2 * per_step + tT * H * 4
    try:
        phys_vmem = pltpu.get_tpu_info().vmem_capacity_bytes
    except Exception:
        phys_vmem = 64 * 1024 * 1024       # v7x lower bound
    vmem_limit = int(min(int(0.75 * phys_vmem),
                         max(2 * vmem_needed, 32 * 1024 * 1024)))

    act_e = min(top_k if top_k is not None else E, E)
    cost = pl.CostEstimate(
        flops=int(6 * T * I * H * act_e),                    # gate+up+down GEMMs
        transcendentals=int(T * I * act_e),                  # silu sigmoid
        bytes_accessed=int(2 * T * H * h_item + E * 3 * I * H * w_item + E * T * 4),
    )

    return pl.pallas_call(
        _expert_mlp_kernel,
        out_shape=jax.ShapeDtypeStruct((T, H), hidden_states.dtype),
        grid_spec=pltpu.PrefetchScalarGridSpec(
            num_scalar_prefetch=2,
            grid=(n_t, E, n_i),
            in_specs=[
                pl.BlockSpec((tT, H), _h_map),       # hidden tile (resident over e,i)
                pl.BlockSpec((1, H, tI), _gu_map),   # gate_w[e][:, chunk]
                pl.BlockSpec((1, H, tI), _gu_map),   # up_w[e][:, chunk]
                pl.BlockSpec((1, tI, H), _d_map),    # down_w[e][chunk, :]
                pl.BlockSpec((1, tT, 1), _w_map),    # per-token routing weight column
            ],
            out_specs=pl.BlockSpec((tT, H), _o_map),
            scratch_shapes=[pltpu.VMEM((tT, H), jnp.float32)],
        ),
        compiler_params=pltpu.CompilerParams(
            dimension_semantics=("parallel", "arbitrary", "arbitrary"),
            vmem_limit_bytes=vmem_limit,
        ),
        cost_estimate=cost,
    )(expert_order, num_active, hidden_states, gate_w, up_w, down_w,
      token_expert_weights)


def expert_mlp_wrapper_forward(hidden_states, expert_affinities, expert_indices,
                               seq_len, gate_up_proj, down_proj,
                               normalize_top_k_affinities=True,
                               token_tile=256, inter_tile=512):
    """Forward of ExpertMLPWrapper.

    hidden_states:     (T, H)
    expert_affinities: (T, E) router probabilities (all experts)
    expert_indices:    (T, K) selected top-k expert ids
    seq_len:           unused here (T already flattened tokens)
    """
    T, H = hidden_states.shape
    E, _, twoI = gate_up_proj.shape
    I = twoI // 2
    K = expert_indices.shape[-1]

    # --- densify routing in f32 (precision) with a safe normalization ---
    aff = expert_affinities.astype(jnp.float32)
    sel_mask = jnp.sum(jax.nn.one_hot(expert_indices, E, dtype=jnp.float32), axis=1)
    weights = aff * sel_mask                                   # (T, E) f32
    if normalize_top_k_affinities:
        denom = jnp.sum(weights, axis=-1, keepdims=True)
        weights = jnp.where(denom > 0, weights / jnp.maximum(denom, 1e-20), 0.0)

    # --- tile selection (256-ish tiles for v6e/v7x MXU; alignment-safe) ---
    tT = _pick_tile(T, token_tile, 8)
    tI = _pick_tile(I, inter_tile, 128)
    n_t = T // tT

    # --- per-token-tile active-expert compaction (skip unrouted experts) ---
    w_tiles = weights.reshape(n_t, tT, E)
    tile_active = jnp.any(w_tiles != 0.0, axis=1)                       # (n_t, E)
    num_active = jnp.maximum(
        jnp.sum(tile_active.astype(jnp.int32), axis=-1), 1).astype(jnp.int32)
    expert_order = jnp.argsort(
        jnp.where(tile_active, 0, 1).astype(jnp.int32), axis=-1).astype(jnp.int32)

    # --- split fused gate_up into separate gate / up (lane-aligned I chunks) ---
    gate_w = gate_up_proj[:, :, :I]
    up_w = gate_up_proj[:, :, I:]

    token_expert_weights = jnp.transpose(weights)[:, :, None]           # (E, T, 1) f32

    out = expert_mlp_pallas(hidden_states, gate_w, up_w, down_proj,
                            token_expert_weights, expert_order, num_active,
                            tT=tT, tI=tI, top_k=K)

    # _reduce_output: all-reduce across TP / world group.
    # TODO(synk): single-device run -> reduce_from_tensor_model_parallel_region is identity.
    out = out.astype(jnp.float32).astype(hidden_states.dtype)
    return out


def _reference(hidden_states, expert_affinities, expert_indices,
               gate_up_proj, down_proj, normalize=True):
    T, H = hidden_states.shape
    E = gate_up_proj.shape[0]
    I = gate_up_proj.shape[-1] // 2
    h = hidden_states.astype(jnp.float32)
    sel_mask = jnp.sum(jax.nn.one_hot(expert_indices, E, dtype=jnp.float32), axis=1)
    w = expert_affinities.astype(jnp.float32) * sel_mask
    if normalize:
        w = w / jnp.sum(w, axis=-1, keepdims=True)
    out = jnp.zeros((T, H), jnp.float32)
    for e in range(E):
        gu = h @ gate_up_proj[e].astype(jnp.float32)
        act = jax.nn.silu(gu[:, :I]) * gu[:, I:]
        out = out + w[:, e:e + 1] * (act @ down_proj[e].astype(jnp.float32))
    return out


if __name__ == "__main__":
    # Small config: hidden_size=128, intermediate_size=256, n_routed_experts=8, top_k=2
    T, H, I, E, K = 64, 128, 256, 8, 2
    seq_len = T

    key = jax.random.PRNGKey(0)
    k1, k2, k3, k4 = jax.random.split(key, 4)

    hidden_states = jax.random.normal(k1, (T, H), dtype=jnp.float32)
    # Deterministic fused expert weights (what fuse_experts_weights would produce).
    gate_up_proj = jax.random.normal(k2, (E, H, 2 * I), dtype=jnp.float32) * 0.05
    down_proj = jax.random.normal(k3, (E, I, H), dtype=jnp.float32) * 0.05

    router_logits = jax.random.normal(k4, (T, E), dtype=jnp.float32)
    expert_affinities = jax.nn.softmax(router_logits, axis=-1)          # (T, E)
    _, expert_indices = jax.lax.top_k(router_logits, K)                 # (T, K)
    expert_indices = expert_indices.astype(jnp.int32)

    out = expert_mlp_wrapper_forward(hidden_states, expert_affinities,
                                     expert_indices, seq_len,
                                     gate_up_proj, down_proj,
                                     normalize_top_k_affinities=True,
                                     token_tile=32, inter_tile=128)
    out = jax.block_until_ready(out)

    ref = _reference(hidden_states, expert_affinities, expert_indices,
                     gate_up_proj, down_proj, normalize=True)
    assert out.shape == (T, H)
    assert jnp.allclose(out, ref, atol=2e-3, rtol=2e-3), "mismatch vs reference"

    print("KERNEL_OK")
</pallas_src>

<mosaic_0001>
module attributes {stable_mosaic.version = 11 : i64} {
  func.func @_expert_mlp_kernel(%arg0: i32, %arg1: i32, %arg2: i32, %arg3: memref<2x8xi32, #tpu.memory_space<smem>>, %arg4: memref<2xi32, #tpu.memory_space<smem>>, %arg5: memref<32x128xf32, #tpu.memory_space<vmem>>, %arg6: memref<1x128x128xf32, #tpu.memory_space<vmem>>, %arg7: memref<1x128x128xf32, #tpu.memory_space<vmem>>, %arg8: memref<1x128x128xf32, #tpu.memory_space<vmem>>, %arg9: memref<1x32x1xf32, #tpu.memory_space<vmem>>, %arg10: memref<32x128xf32, #tpu.memory_space<vmem>>, %arg11: memref<32x128xf32, #tpu.memory_space<vmem>>) attributes {dimension_semantics = [#tpu.dimension_semantics<parallel>, #tpu.dimension_semantics<arbitrary>, #tpu.dimension_semantics<arbitrary>], iteration_bounds = array<i64: 2, 8, 2>, scalar_prefetch = 2 : i64, scratch_operands = 1 : i64, tpu.core_type = #tpu.core_type<tc>, window_params = [{transform_indices = @transform_0, window_bounds = array<i64: 32, 128>}, {transform_indices = @transform_1, window_bounds = array<i64: 1, 128, 128>}, {transform_indices = @transform_2, window_bounds = array<i64: 1, 128, 128>}, {transform_indices = @transform_3, window_bounds = array<i64: 1, 128, 128>}, {transform_indices = @transform_4, window_bounds = array<i64: 1, 32, 1>}, {transform_indices = @transform_5, window_bounds = array<i64: 32, 128>}]} {
    %c0_i32 = arith.constant 0 : i32
    %0 = arith.cmpi eq, %arg1, %c0_i32 : i32
    %c0_i32_0 = arith.constant 0 : i32
    %1 = arith.cmpi eq, %arg2, %c0_i32_0 : i32
    %2 = arith.andi %0, %1 : i1
    %3 = arith.extui %2 : i1 to i32
    %c0_i32_1 = arith.constant 0 : i32
    %4 = arith.cmpi ne, %3, %c0_i32_1 : i32
    scf.if %4 {
      %cst = arith.constant 0.000000e+00 : f32
      %15 = vector.broadcast %cst : f32 to vector<32x128xf32>
      %c0 = arith.constant 0 : index
      %c0_4 = arith.constant 0 : index
      %16 = vector.load %arg11[%c0, %c0_4] : memref<32x128xf32, #tpu.memory_space<vmem>>, vector<32x128xf32>
      tpu.vector_store %arg11[%c0, %c0_4], %15 {strides = array<i32>} : memref<32x128xf32, #tpu.memory_space<vmem>>, vector<32x128xf32>,
    } else {
    }
    %5 = arith.index_cast %arg0 : i32 to index
    %6 = memref.load %arg4[%5] : memref<2xi32, #tpu.memory_space<smem>>
    %7 = arith.cmpi slt, %arg1, %6 : i32
    %8 = arith.extui %7 : i1 to i32
    %c0_i32_2 = arith.constant 0 : i32
    %9 = arith.cmpi ne, %8, %c0_i32_2 : i32
    scf.if %9 {
      %c0 = arith.constant 0 : index
      %c0_4 = arith.constant 0 : index
      %15 = vector.load %arg5[%c0, %c0_4] : memref<32x128xf32, #tpu.memory_space<vmem>>, vector<32x128xf32>
      %c0_5 = arith.constant 0 : index
      %c0_6 = arith.constant 0 : index
      %c0_7 = arith.constant 0 : index
      %16 = vector.load %arg6[%c0_5, %c0_6, %c0_7] : memref<1x128x128xf32, #tpu.memory_space<vmem>>, vector<1x128x128xf32>
      %17 = vector.shape_cast %16 : vector<1x128x128xf32> to vector<128x128xf32>
      %cst = arith.constant dense<0.000000e+00> : vector<32x128xf32>
      %18 = tpu.matmul %15, %17, %cst {dimension_numbers = #tpu.dot_dimension_numbers<[1], [0], [0], [1], [0, 0, 1, 1], [], []>} : vector<32x128xf32>, vector<128x128xf32>, vector<32x128xf32> -> vector<32x128xf32>
      %c0_8 = arith.constant 0 : index
      %c0_9 = arith.constant 0 : index
      %c0_10 = arith.constant 0 : index
      %19 = vector.load %arg7[%c0_8, %c0_9, %c0_10] : memref<1x128x128xf32, #tpu.memory_space<vmem>>, vector<1x128x128xf32>
      %20 = vector.shape_cast %19 : vector<1x128x128xf32> to vector<128x128xf32>
      %cst_11 = arith.constant dense<0.000000e+00> : vector<32x128xf32>
      %21 = tpu.matmul %15, %20, %cst_11 {dimension_numbers = #tpu.dot_dimension_numbers<[1], [0], [0], [1], [0, 0, 1, 1], [], []>} : vector<32x128xf32>, vector<128x128xf32>, vector<32x128xf32> -> vector<32x128xf32>
      %22 = arith.negf %18 : vector<32x128xf32>
      %23 = math.exp %22 : vector<32x128xf32>
      %cst_12 = arith.constant 1.000000e+00 : f32
      %24 = vector.broadcast %cst_12 : f32 to vector<32x128xf32>
      %25 = arith.addf %24, %23 : vector<32x128xf32>
      %26 = arith.divf %24, %25 : vector<32x128xf32>
      %27 = arith.mulf %18, %26 : vector<32x128xf32>
      %28 = arith.mulf %27, %21 : vector<32x128xf32>
      %c0_13 = arith.constant 0 : index
      %c0_14 = arith.constant 0 : index
      %c0_15 = arith.constant 0 : index
      %29 = vector.load %arg9[%c0_13, %c0_14, %c0_15] : memref<1x32x1xf32, #tpu.memory_space<vmem>>, vector<1x32x1xf32>
      %30 = vector.shape_cast %29 : vector<1x32x1xf32> to vector<32x1xf32>
      %31 = vector.broadcast %30 : vector<32x1xf32> to vector<32x128xf32>
      %32 = arith.mulf %28, %31 : vector<32x128xf32>
      %c0_16 = arith.constant 0 : index
      %c0_17 = arith.constant 0 : index
      %33 = vector.load %arg11[%c0_16, %c0_17] : memref<32x128xf32, #tpu.memory_space<vmem>>, vector<32x128xf32>
      %c0_18 = arith.constant 0 : index
      %c0_19 = arith.constant 0 : index
      %c0_20 = arith.constant 0 : index
      %34 = vector.load %arg8[%c0_18, %c0_19, %c0_20] : memref<1x128x128xf32, #tpu.memory_space<vmem>>, vector<1x128x128xf32>
      %35 = vector.shape_cast %34 : vector<1x128x128xf32> to vector<128x128xf32>
      %cst_21 = arith.constant dense<0.000000e+00> : vector<32x128xf32>
      %36 = tpu.matmul %32, %35, %cst_21 {dimension_numbers = #tpu.dot_dimension_numbers<[1], [0], [0], [1], [0, 0, 1, 1], [], []>} : vector<32x128xf32>, vector<128x128xf32>, vector<32x128xf32> -> vector<32x128xf32>
      %37 = arith.addf %33, %36 : vector<32x128xf32>
      %c0_22 = arith.constant 0 : index
      %c0_23 = arith.constant 0 : index
      %38 = vector.load %arg11[%c0_22, %c0_23] : memref<32x128xf32, #tpu.memory_space<vmem>>, vector<32x128xf32>
      tpu.vector_store %arg11[%c0_22, %c0_23], %37 {strides = array<i32>} : memref<32x128xf32, #tpu.memory_space<vmem>>, vector<32x128xf32>,
    } else {
    }
    %c7_i32 = arith.constant 7 : i32
    %10 = arith.cmpi eq, %arg1, %c7_i32 : i32
    %c1_i32 = arith.constant 1 : i32
    %11 = arith.cmpi eq, %arg2, %c1_i32 : i32
    %12 = arith.andi %10, %11 : i1
    %13 = arith.extui %12 : i1 to i32
    %c0_i32_3 = arith.constant 0 : i32
    %14 = arith.cmpi ne, %13, %c0_i32_3 : i32
    scf.if %14 {
      %c0 = arith.constant 0 : index
      %c0_4 = arith.constant 0 : index
      %15 = vector.load %arg11[%c0, %c0_4] : memref<32x128xf32, #tpu.memory_space<vmem>>, vector<32x128xf32>
      %c0_5 = arith.constant 0 : index
      %c0_6 = arith.constant 0 : index
      %16 = vector.load %arg10[%c0_5, %c0_6] : memref<32x128xf32, #tpu.memory_space<vmem>>, vector<32x128xf32>
      tpu.vector_store %arg10[%c0_5, %c0_6], %15 {strides = array<i32>} : memref<32x128xf32, #tpu.memory_space<vmem>>, vector<32x128xf32>,
    } else {
    }
    return
  }
  func.func @transform_0(%arg0: i32, %arg1: i32, %arg2: i32, %arg3: memref<2x8xi32, #tpu.memory_space<smem>>, %arg4: memref<2xi32, #tpu.memory_space<smem>>) -> (i32, i32) {
    %c0_i32 = arith.constant 0 : i32
    %c0_i32_0 = arith.constant 0 : i32
    return %arg0, %c0_i32 : i32, i32
  }
  func.func @transform_1(%arg0: i32, %arg1: i32, %arg2: i32, %arg3: memref<2x8xi32, #tpu.memory_space<smem>>, %arg4: memref<2xi32, #tpu.memory_space<smem>>) -> (i32, i32, i32) {
    %0 = arith.index_cast %arg0 : i32 to index
    %1 = memref.load %arg4[%0] : memref<2xi32, #tpu.memory_space<smem>>
    %2 = arith.cmpi slt, %arg1, %1 : i32
    %3 = arith.index_cast %arg0 : i32 to index
    %4 = memref.load %arg4[%3] : memref<2xi32, #tpu.memory_space<smem>>
    %c1_i32 = arith.constant 1 : i32
    %5 = arith.subi %4, %c1_i32 : i32
    %6 = arith.minsi %arg1, %5 : i32
    %7 = arith.index_cast %arg0 : i32 to index
    %8 = arith.index_cast %6 : i32 to index
    %9 = memref.load %arg3[%7, %8] : memref<2x8xi32, #tpu.memory_space<smem>>
    %c1_i32_0 = arith.constant 1 : i32
    %10 = arith.select %2, %arg2, %c1_i32_0 : i32
    %c0_i32 = arith.constant 0 : i32
    %c0_i32_1 = arith.constant 0 : i32
    return %9, %c0_i32, %10 : i32, i32, i32
  }
  func.func @transform_2(%arg0: i32, %arg1: i32, %arg2: i32, %arg3: memref<2x8xi32, #tpu.memory_space<smem>>, %arg4: memref<2xi32, #tpu.memory_space<smem>>) -> (i32, i32, i32) {
    %0 = arith.index_cast %arg0 : i32 to index
    %1 = memref.load %arg4[%0] : memref<2xi32, #tpu.memory_space<smem>>
    %2 = arith.cmpi slt, %arg1, %1 : i32
    %3 = arith.index_cast %arg0 : i32 to index
    %4 = memref.load %arg4[%3] : memref<2xi32, #tpu.memory_space<smem>>
    %c1_i32 = arith.constant 1 : i32
    %5 = arith.subi %4, %c1_i32 : i32
    %6 = arith.minsi %arg1, %5 : i32
    %7 = arith.index_cast %arg0 : i32 to index
    %8 = arith.index_cast %6 : i32 to index
    %9 = memref.load %arg3[%7, %8] : memref<2x8xi32, #tpu.memory_space<smem>>
    %c1_i32_0 = arith.constant 1 : i32
    %10 = arith.select %2, %arg2, %c1_i32_0 : i32
    %c0_i32 = arith.constant 0 : i32
    %c0_i32_1 = arith.constant 0 : i32
    return %9, %c0_i32, %10 : i32, i32, i32
  }
  func.func @transform_3(%arg0: i32, %arg1: i32, %arg2: i32, %arg3: memref<2x8xi32, #tpu.memory_space<smem>>, %arg4: memref<2xi32, #tpu.memory_space<smem>>) -> (i32, i32, i32) {
    %0 = arith.index_cast %arg0 : i32 to index
    %1 = memref.load %arg4[%0] : memref<2xi32, #tpu.memory_space<smem>>
    %2 = arith.cmpi slt, %arg1, %1 : i32
    %3 = arith.index_cast %arg0 : i32 to index
    %4 = memref.load %arg4[%3] : memref<2xi32, #tpu.memory_space<smem>>
    %c1_i32 = arith.constant 1 : i32
    %5 = arith.subi %4, %c1_i32 : i32
    %6 = arith.minsi %arg1, %5 : i32
    %7 = arith.index_cast %arg0 : i32 to index
    %8 = arith.index_cast %6 : i32 to index
    %9 = memref.load %arg3[%7, %8] : memref<2x8xi32, #tpu.memory_space<smem>>
    %c1_i32_0 = arith.constant 1 : i32
    %10 = arith.select %2, %arg2, %c1_i32_0 : i32
    %c0_i32 = arith.constant 0 : i32
    %c0_i32_1 = arith.constant 0 : i32
    return %9, %10, %c0_i32 : i32, i32, i32
  }
  func.func @transform_4(%arg0: i32, %arg1: i32, %arg2: i32, %arg3: memref<2x8xi32, #tpu.memory_space<smem>>, %arg4: memref<2xi32, #tpu.memory_space<smem>>) -> (i32, i32, i32) {
    %0 = arith.index_cast %arg0 : i32 to index
    %1 = memref.load %arg4[%0] : memref<2xi32, #tpu.memory_space<smem>>
    %c1_i32 = arith.constant 1 : i32
    %2 = arith.subi %1, %c1_i32 : i32
    %3 = arith.minsi %arg1, %2 : i32
    %4 = arith.index_cast %arg0 : i32 to index
    %5 = arith.index_cast %3 : i32 to index
    %6 = memref.load %arg3[%4, %5] : memref<2x8xi32, #tpu.memory_space<smem>>
    %c0_i32 = arith.constant 0 : i32
    %c0_i32_0 = arith.constant 0 : i32
    return %6, %arg0, %c0_i32 : i32, i32, i32
  }
  func.func @transform_5(%arg0: i32, %arg1: i32, %arg2: i32, %arg3: memref<2x8xi32, #tpu.memory_space<smem>>, %arg4: memref<2xi32, #tpu.memory_space<smem>>) -> (i32, i32) {
    %c0_i32 = arith.constant 0 : i32
    %c0_i32_0 = arith.constant 0 : i32
    return %arg0, %c0_i32 : i32, i32
  }
}

</mosaic_0001>

<bundles_post_ra>
// kernel: tpu_custom_call.1
= control target key start
LH: loop header
LB: loop body
LE: loop exit
PB: predicated region body
PF: predicated region fallthrough
CT: control target
= control target key end

     0   :  { %s1774_s30 = smov [#allocation4]   ;;  %s1775_s8 = smov [#allocation5]   ;;  %s2514_s0 = inlined_call_operand.vmem [shape: s32[2,8], index: 0, kind: input, shape index: {}]   ;;  %s2515_s2 = inlined_call_operand.vmem [shape: f32[64,128], index: 2, kind: input, shape index: {}]   ;;  %s2516_s3 = inlined_call_operand.hbm [shape: f32[8,128,256], index: 3, kind: input, shape index: {}]   ;;  %s2517_s4 = inlined_call_operand.hbm [shape: f32[8,128,256], index: 4, kind: input, shape index: {}]   ;;  %s2518_s5 = inlined_call_operand.hbm [shape: f32[8,256,128], index: 5, kind: input, shape index: {}]   ;;  %s2519_s6 = inlined_call_operand.vmem [shape: f32[8,64,1], index: 6, kind: input, shape index: {}]   ;;  %s2520_s7 = inlined_call_operand.hbm [shape: f32[64,128], index: 7, kind: output, shape index: {}]   ;;  %s2521_s1 = inlined_call_operand.vmem [shape: s32[2], index: 1, kind: input, shape index: {}]  }
   0x1   :  { %2562 = sst [smem:[#allocation53_spill]] %s2515_s2  ;;  %s13_s26 = sshll.u32 %s2514_s0, 4  ;;  %s14_s26 = int_to_ptr.vmem [resolvable:$true] %s13_s26 }
   0x2   :  { %2563 = sst [smem:[#allocation54_spill]] %s2516_s3  ;;  %s18_s29 = sshll.u32 %s2521_s1, 4  ;;  %s19_s29 = int_to_ptr.vmem [resolvable:$true] %s18_s29 }
   0x3   :  { %2564 = sst [smem:[#allocation55_spill]] %s2517_s4 }
   0x4   :  { %2565 = sst [smem:[#allocation56_spill]] %s2518_s5 }
   0x5   :  { %2566 = sst [smem:[#allocation57_spill]] %s2519_s6 }
   0x6   :  { %2567 = sst [smem:[#allocation58_spill]] %s2520_s7 }
   0x7   :  { %16 = dma.vmem_to_smem %s14_s26, 32, %s1774_s30, [#allocation3] }
   0x8   :  { %21 = dma.vmem_to_smem %s19_s29, 16, %s1775_s8, [#allocation3] }
   0x9   :  { %1680 = dma.done.wait [#allocation3], 48 }
   0xa   :  { %1681 = vsyncadd [#allocation3], 4294967248 }
   0xb   :  { %24 = sfence }
   0xc   :  { %25 = vsyncpa [#allocation7], 0 }
   0xd   :  { %27 = vsyncpa [#allocation7 + $0x1], 0 }
   0xe   :  { %28 = vsyncpa [#allocation10], 0 }
   0xf   :  { %30 = vsyncpa [#allocation10 + $0x1], 0 }
  0x10   :  { %31 = vsyncpa [#allocation8], 0 }
  0x11   :  { %33 = vsyncpa [#allocation8 + $0x1], 0  ;;  %s1829_s0 = smov 0   ;;  %s1831_s9 = smov 0  }
  0x12   :  { %s1833_s1 = smov 0   ;;  %s1835_s10 = smov 0  }
  0x13   :  { %s1837_s11 = smov 0   ;;  %s1839_s12 = smov 0  }
  0x14   :  { %s1841_s13 = smov 0   ;;  %s1843_s14 = smov 0  }
  0x15   :  { %s1845_s15 = smov 0   ;;  %s1847_s16 = smov 0  }
  0x16   :  { %s1849_s17 = smov 0   ;;  %s1851_s18 = smov 0  }
  0x17   :  { %s1853_s19 = smov 0   ;;  %s1855_s20 = smov 0  }
  0x18   :  { %s1857_s21 = smov 0   ;;  %s1859_s22 = smov 0  }
  0x19   :  { %s1861_s23 = smov 0   ;;  %s1863_s24 = smov 0  }
  0x1a   :  { %s1865_s25 = smov 0  }
  0x1b LB: > { %2568 = sst [smem:[#allocation30_spill]] %s1700_s0  ;;  %p129_p0 = scmp.eq.s32.totalorder %s1772_s25, 0  ;;  %s1772_s25 = sphi %s1865_s25, %s39_s25   ;;  %s1768_s24 = sphi %s1863_s24, %s2682_s24   ;;  %s1764_s23 = sphi %s1861_s23, %s2681_s23   ;;  %s1760_s22 = sphi %s1859_s22, %s2680_s22   ;;  %s1756_s21 = sphi %s1857_s21, %s2679_s21   ;;  %s1752_s20 = sphi %s1855_s20, %s2678_s20   ;;  %s1748_s19 = sphi %s1853_s19, %s2677_s19   ;;  %s1744_s18 = sphi %s1851_s18, %s2669_s18   ;;  %s1740_s17 = sphi %s1849_s17, %s2668_s17   ;;  %s1736_s16 = sphi %s1847_s16, %s2667_s16   ;;  %s1732_s15 = sphi %s1845_s15, %s2666_s15   ;;  %s1728_s14 = sphi %s1843_s14, %s2676_s14   ;;  %s1724_s13 = sphi %s1841_s13, %s2664_s13   ;;  %s1720_s12 = sphi %s1839_s12, %s2675_s12   ;;  %s1716_s11 = sphi %s1837_s11, %s2674_s11   ;;  %s1712_s10 = sphi %s1835_s10, %s2662_s10   ;;  %s1708_s1 = sphi %s1833_s1, %s2661_s1   ;;  %s1704_s9 = sphi %s1831_s9, %s2660_s9   ;;  %s1700_s0 = sphi %s1829_s0, %s2659_s0  }
  0x1c   : > { %2569 = sst [smem:[#allocation31_spill]] %s1704_s9  ;;  %p184_p1 = scmp.ne.s32.totalorder %s1732_s15, %s1728_s14 }
  0x1d   : > { %2570 = sst [smem:[#allocation32_spill]] %s1708_s1  ;;  %p2556_p2 = scmp.lt.s32.totalorder %s1772_s25, 32 }
  0x1e   : > { %2571 = sst [smem:[#allocation33_spill]] %s1716_s11  ;;  %p1930_p3 = por %p184_p1, %p129_p0 }
  0x1f   : > { %2572 = sst [smem:[#allocation34_spill]] %s1728_s14  ;;  %s396_s27 = sand.u32 1, %s1732_s15  }
  0x20   : > { %2573 = sst [smem:[#allocation35_spill]] %s1732_s15  ;;  %s1185_s29 = sshll.u32 %s396_s27, 7 }
  0x21   : > { %2574 = sst [smem:[#allocation36_spill]] %s1740_s17  ;;  %p1940_p4 = pnand %p2556_p2, %p1930_p3 }
  0x22   : > { %2575 = sst [smem:[#allocation37_spill]] %s1744_s18  ;;  %s398_s6 = scalar_lea.vmem [#allocation9], %s1185_s29 }
  0x23   : > { %2576 = sst [smem:[#allocation38_spill]] %s1748_s19  ;;  %s1955_s2 = sshll.u32 %s398_s6, 4 }
  0x24   : > { %2577 = sst [smem:[#allocation39_spill]] %s1752_s20  ;;  %s1971_s9 = sadd.s32 4294967295, %s1772_s25  }
  0x25   : > { %2578 = sst [smem:[#allocation40_spill]] %s1756_s21  ;;  %p1490_p9 = pneg %p1940_p4 }
  0x26   : > { %s1240_s8 = scalar_select %p1930_p3, [#allocation5], [#allocation15] }
  0x27   : > { %s1241_s7 = scalar_select %p1930_p3, %s1768_s24, 0 }
  0x28   : > { %s2684_s8 = smov (!%p2556_p2, %s1240_s8), [#allocation21]  ;;  %2581 = sst [smem:[#allocation41_spill]] %s1955_s2 }
  0x29   : > { %s2686_s7 = smov (!%p2556_p2, %s1241_s7), 0  ;;  %s2582_s4 = sld [smem:[#allocation55_spill]] }
  0x2a   : > { %s1242_s28 = scalar_select %p1930_p3, [#allocation4], [#allocation16] }
  0x2b   : > { %s399_s27 = sld [smem:[%s2684_s8 + %s2686_s7]] }
  0x2c   : > { %s2688_s28 = smov (!%p2556_p2, %s1242_s28), [#allocation22] }
  0x31   : > { %p400_p5 = scmp.lt.s32.totalorder %s1764_s23, %s399_s27  ;;  %s1186_s19 = sadd.s32 4294967295, %s399_s27 }
  0x32   : > { %p402_p6 = scmp.lt.s32.totalorder %s1764_s23, %s1186_s19  ;;  %s51_s27 = sadd.s32 1, %s1760_s22 }
  0x33   : > { %s412_s20 = scalar_select %p400_p5, %s1760_s22, 1 }
  0x34   : > { %s403_s21 = scalar_select %p402_p6, %s1764_s23, %s1186_s19 }
  0x35   : > { %p1979_p7 = scmp.ge.s32.totalorder %s51_s27, 2 }
  0x36   : > { %s404_s5 = sshra.s32 %s403_s21, 7  ;;  %s409_s3 = sand.u32 127, %s403_s21 }
  0x37   : > { %s406_s7 = sadd.s32 %s1768_s24, %s404_s5 }
  0x38   : > { %s1187_s29 = sshll.u32 %s406_s7, 7  ;;  %s1984_s7 = sld [smem:[#allocation5 + %s1768_s24]] }
  0x39   : > { %s410_s6 = sadd.s32 %s1187_s29, %s409_s3  ;;  %s2584_s29 = sand.u32 1, %s1772_s25  }
  0x3a   : > { %s2690_s6 = smov (!%p1930_p3, %s410_s6), 0 }
  0x3b   : > { %s2692_s6 = smov (!%p2556_p2, %s2690_s6), 0 }
  0x3c   : > { %s411_s8 = sld [smem:[%s2688_s28 + %s2692_s6]]  ;;  %s54_s28 = sadd.s32 1, %s1764_s23 }
  0x42   : > { %s1188_s2 = sshll.u32 %s411_s8, 5  ;;  %s1493_s8 = scalar_lea.hbm %s2582_s4, 2048 }
  0x43   : > { %s416_s0 = sadd.s32 %s1188_s2, %s412_s20  ;;  %s1989_s2 = scalar_lea.sflag [#allocation10], %s2584_s29 }
  0x44   : > { %s1189_s19 = sshll.u32 %s416_s0, 3  ;;  %2585 = sst [smem:[#allocation42_spill]] %s1989_s2 }
  0x45   : > { %s418_s5 = scalar_lea.hbm %s2582_s4, %s1189_s19 }
  0x46   : > { %s419_s26 = sshll.u32 %s418_s5, 4  ;;  %s420_s26 = int_to_ptr.hbm [resolvable:$true] %s419_s26 }
  0x47   : > { %s1486_s20 = sshra.s32 %s420_s26, 4  ;;  %s1487_s20 = int_to_ptr.hbm [resolvable:$true] %s1486_s20 }
  0x48   : > { %s1488_s0 = scalar_lea.hbm %s1487_s20, 128  ;;  %p1494_p12 = scmp.lt.s32.totalorder %s1487_s20, %s2582_s4 }
  0x49   : > { %p1489_p8 = scmp.ne.s32.totalorder %s1487_s20, %s1488_s0  ;;  %p1495_p13 = scmp.lt.s32.totalorder %s1493_s8, %s1488_s0 }
  0x4b   : > { %p1491_p10 = pnand %p1490_p9, %p1489_p8  ;;  %p1496_p1 = por %p1495_p13, %p1494_p12 }
  0x4d   : > { %p1492_p11 = pneg %p1491_p10 }
  0x4f   : > { %p1497_p3 = pnand %p1496_p1, %p1492_p11 }
  0x51   : > { %1500 = shalt.err (!%p1497_p3)
}
  0x52   : > { %s2532_s5 = smov 256   ;;  %s2586_s29 = sld [smem:[#allocation41_spill]] }
  0x53   : > { %s2533_s20 = smov 128   ;;  %s2535_s0 = smov 8  }
  0x54   : > { %s2694_s27 = smov (%p1979_p7, %s51_s27), 0  ;;  %s2696_s28 = smov (!%p1979_p7, %s54_s28), %s1764_s23 }
  0x55   : > { %2588 = sst [smem:[#allocation43_spill]] %s2694_s27  ;;  %s58_s6 = sadd.s32 1, %s1768_s24 }
  0x56   : > { %p128_p5 = scmp.ne.s32.totalorder %s1744_s18, %s1740_s17  ;;  %p56_p6 = scmp.ge.s32.totalorder %s2696_s28, 8 }
  0x57   : > { %p134_p8 = scmp.ne.s32.totalorder %s1740_s17, %s1736_s16  ;;  %p89_p9 = scmp.lt.s32.totalorder %s1764_s23, %s1984_s7 }
  0x58   : > { %s2587_s11 = int_to_ptr.vmem [resolvable:$true] %s2586_s29  ;;  %s1162_s30 = sadd.s32 4294967295, %s1984_s7 }
  0x59   : > { %1269 = dma.hbm_to_vmem [thread:$0]  (!%p1940_p4), %s420_s26, 2048, %s2587_s11, %s1989_s2, %s2532_s5, %s2533_s20, %s2535_s0  }
  0x5a   : > { %s2698_s28 = smov (%p56_p6, %s2696_s28), 0  ;;  %s2700_s6 = smov (!%p56_p6, %s58_s6), %s1768_s24 }
  0x5b   : > { %2589 = sst [smem:[#allocation44_spill]] %s2698_s28  ;;  %p91_p4 = scmp.lt.s32.totalorder %s1764_s23, %s1162_s30 }
  0x5c   : > { %p135_p7 = scmp.eq.s32.totalorder %s1971_s9, 0  ;;  %p60_p10 = scmp.ge.s32.totalorder %s2700_s6, 2 }
  0x5d   : > { %s2030_s3 = sld [smem:[#allocation5 + %s1768_s24]]  ;;  %p2054_p12 = por %p129_p0, %p128_p5 }
  0x5e   : > { %s92_s26 = scalar_select %p91_p4, %s1764_s23, %s1162_s30 }
  0x5f   : > { %s2702_s6 = smov (%p60_p10, %s2700_s6), 0  ;;  %p2042_p11 = por %p135_p7, %p134_p8 }
  0x60   : > { %2590 = sst [smem:[#allocation45_spill]] %s2702_s6  ;;  %s93_s8 = sshra.s32 %s92_s26, 7 }
  0x61   : > { %s98_s19 = sand.u32 127, %s92_s26  ;;  %s95_s21 = sadd.s32 %s1768_s24, %s93_s8 }
  0x62   : > { %s102_s29 = sld [smem:[#allocation5 + %s2702_s6]]  ;;  %s1163_s11 = sshll.u32 %s95_s21, 7 }
  0x63   : > { %s2591_s30 = scalar_select %p2042_p11, 1, 0 }
  0x64   : > { %s99_s5 = sadd.s32 %s1163_s11, %s98_s19  ;;  %p145_p13 = scmp.lt.s32.totalorder %s1764_s23, %s2030_s3 }
  0x65   : > { %2592 = sst [smem:[#allocation41_spill]] %s2591_s30  ;;  %p190_p6 = scmp.ne.s32.totalorder %s1728_s14, %s1724_s13 }
  0x66   : > { %s2047_s0 = sld [smem:[#allocation4 + %s99_s5]]  ;;  %s1166_s5 = sadd.s32 4294967295, %s2030_s3 }
  0x67   : > { %s2593_s26 = scalar_select %p2054_p12, 1, 0 }
  0x68   : > { %s2062_s16 = scalar_select %p89_p9, %s1760_s22, 1 }
  0x69   : > { %2594 = sst [smem:[#allocation46_spill]] %s2593_s26  ;;  %p103_p1 = scmp.lt.s32.totalorder %s2698_s28, %s102_s29 }
  0x6a   : > { %s2067_s8 = sld [smem:[#allocation5 + %s2702_s6]]  ;;  %s1164_s19 = sadd.s32 4294967295, %s102_s29 }
  0x6b   : > { %p105_p3 = scmp.lt.s32.totalorder %s2698_s28, %s1164_s19  ;;  %p147_p5 = scmp.lt.s32.totalorder %s1764_s23, %s1166_s5 }
  0x6c   : > { %s115_s21 = scalar_select %p103_p1, %s2694_s27, 1 }
  0x6d   : > { %s106_s11 = scalar_select %p105_p3, %s2698_s28, %s1164_s19 }
  0x6e   : > { %s117_s30 = ssub.s32 %s2062_s16, %s115_s21  ;;  %p2083_p8 = por %p190_p6, %p135_p7 }
  0x6f   : > { %s107_s7 = sshra.s32 %s106_s11, 7  ;;  %s112_s1 = sand.u32 127, %s106_s11 }
  0x70   : > { %s109_s20 = sadd.s32 %s107_s7, %s2702_s6  ;;  %s1168_s2 = sadd.s32 4294967295, %s2067_s8 }
  0x71   : > { %s1165_s29 = sshll.u32 %s109_s20, 7  ;;  %p161_p9 = scmp.lt.s32.totalorder %s2698_s28, %s1168_s2 }
  0x72   : > { %s113_s17 = sadd.s32 %s1165_s29, %s112_s1  ;;  %s2097_s21 = sld [smem:[#allocation5 + %s1768_s24]] }
  0x73   : > { %s114_s26 = sld [smem:[#allocation4 + %s113_s17]]  ;;  %p159_p4 = scmp.lt.s32.totalorder %s2698_s28, %s2067_s8 }
  0x74   : > { %s2595_s19 = scalar_select %p2083_p8, 1, 0 }
  0x75   : > { %s148_s13 = scalar_select %p147_p5, %s1764_s23, %s1166_s5 }
  0x76   : > { %2596 = sst [smem:[#allocation47_spill]] %s2595_s19 }
  0x77   : > { %s2092_s11 = scalar_select %p145_p13, %s1760_s22, 1 }
  0x78   : > { %s149_s7 = sshra.s32 %s148_s13, 7  ;;  %s154_s16 = sand.u32 127, %s148_s13 }
  0x79   : > { %s151_s20 = sadd.s32 %s1768_s24, %s149_s7  ;;  %s116_s17 = ssub.s32 %s2047_s0, %s114_s26 }
  0x7a   : > { %s1167_s1 = sshll.u32 %s151_s20, 7  ;;  %s118_s29 = sor.u32 %s117_s30, %s116_s17 }
  0x7b   : > { %s2103_s3 = sld [smem:[#allocation5 + %s2702_s6]]  ;;  %p119_p10 = scmp.eq.s32.totalorder %s118_s29, 0 }
  0x7c   : > { %s155_s5 = sadd.s32 %s1167_s1, %s154_s16  ;;  %s2597_s7 = sadd.s32 1, %s1744_s18 }
  0x7d   : > { %s162_s13 = scalar_select %p161_p9, %s2698_s28, %s1168_s2 }
  0x7e   : > { %s2109_s20 = scalar_select %p119_p10, %s1744_s18, %s2597_s7  }
  0x7f   : > { %s163_s0 = sshra.s32 %s162_s13, 7  ;;  %s168_s26 = sand.u32 127, %s162_s13 }
  0x80   : > { %2598 = sst [smem:[#allocation48_spill]] %s2109_s20  ;;  %s165_s17 = sadd.s32 %s163_s0, %s2702_s6 }
  0x81   : > { %s156_s30 = sld [smem:[#allocation4 + %s155_s5]]  ;;  %s1169_s4 = sshll.u32 %s165_s17, 7 }
  0x82   : > { %s1170_s19 = sadd.s32 4294967295, %s2097_s21  ;;  %s169_s14 = sadd.s32 %s1169_s4, %s168_s26 }
  0x83   : > { %p203_p13 = scmp.lt.s32.totalorder %s1764_s23, %s1170_s19  ;;  %s170_s29 = sld [smem:[#allocation4 + %s169_s14]] }
  0x84   : > { %p201_p1 = scmp.lt.s32.totalorder %s1764_s23, %s2097_s21  ;;  %p215_p3 = scmp.lt.s32.totalorder %s2698_s28, %s2103_s3 }
  0x85   : > { %s171_s2 = scalar_select %p159_p4, %s2694_s27, 1 }
  0x86   : > { %s204_s16 = scalar_select %p203_p13, %s1764_s23, %s1170_s19 }
  0x87   : > { %s173_s1 = ssub.s32 %s2092_s11, %s171_s2  ;;  %s1172_s4 = sadd.s32 4294967295, %s2103_s3 }
  0x88   : > { %s205_s5 = sshra.s32 %s204_s16, 7  ;;  %s210_s13 = sand.u32 127, %s204_s16 }
  0x89   : > { %s207_s14 = sadd.s32 %s1768_s24, %s205_s5  ;;  %s172_s7 = ssub.s32 %s156_s30, %s170_s29 }
  0x8a   : > { %s1171_s0 = sshll.u32 %s207_s14, 7  ;;  %s2599_s8 = sld [smem:[#allocation33_spill]] }
  0x8b   : > { %s174_s26 = sor.u32 %s173_s1, %s172_s7  ;;  %p217_p5 = scmp.lt.s32.totalorder %s2698_s28, %s1172_s4 }
  0x8c   : > { %p175_p6 = scmp.eq.s32.totalorder %s174_s26, 0  ;;  %s211_s19 = sadd.s32 %s1171_s0, %s210_s13 }
  0x8d   : > { %s213_s11 = scalar_select %p201_p1, %s1760_s22, 1 }
  0x8e   : > { %s2600_s17 = sadd.s32 1, %s1732_s15  ;;  %s2602_s20 = sld [smem:[#allocation32_spill]] }
  0x8f   : > { %s2134_s2 = scalar_select %p175_p6, %s1732_s15, %s2600_s17  }
  0x90   : > { %s218_s18 = scalar_select %p217_p5, %s2698_s28, %s1172_s4 }
  0x91   : > { %2601 = sst [smem:[#allocation49_spill]] %s2134_s2  ;;  %s233_s21 = sadd.s32 1, %s1720_s12 }
  0x92   : > { %s2603_s16 = sld [smem:[#allocation31_spill]]  ;;  %s219_s29 = sshra.s32 %s218_s18, 7 }
  0x93   : > { %s227_s30 = scalar_select %p215_p3, %s2694_s27, 1 }
  0x94   : > { %s224_s1 = sand.u32 127, %s218_s18  ;;  %s221_s5 = sadd.s32 %s219_s29, %s2702_s6 }
  0x95   : > { %s2604_s14 = sld [smem:[#allocation30_spill]]  ;;  %s1173_s7 = sshll.u32 %s221_s5, 7 }
  0x96   : > { %s212_s13 = sld [smem:[#allocation4 + %s211_s19]]  ;;  %s225_s0 = sadd.s32 %s1173_s7, %s224_s1 }
  0x97   : > { %p246_p9 = scmp.ne.s32.totalorder %s2599_s8, %s1712_s10  ;;  %s226_s26 = sld [smem:[#allocation4 + %s225_s0]] }
  0x98   : > { %s229_s3 = ssub.s32 %s213_s11, %s227_s30  ;;  %s308_s18 = ssub.s32 %s1768_s24, %s2702_s6 }
  0x99   : > { %p2147_p4 = por %p246_p9, %p135_p7  ;;  %p309_p10 = scmp.eq.s32.totalorder %s308_s18, 0 }
  0x9a   : > { %s311_s19 = sadd.s32 1, %s2602_s20  ;;  %p321_p13 = scmp.ne.s32.totalorder %s2602_s20, %s2603_s16 }
  0x9b   : > { %s2606_s4 = scalar_select %p2147_p4, 1, 0 }
  0x9c   : > { %p322_p1 = scmp.eq.s32.totalorder %s1971_s9, 31  ;;  %s2607_s10 = sld [smem:[#allocation37_spill]] }
  0x9d   : > { %s2704_s20 = smov (!%p309_p10, %s2602_s20), %s311_s19  ;;  %p327_p7 = scmp.ne.s32.totalorder %s2603_s16, %s2604_s14 }
  0x9e   : > { %2608 = sst [smem:[#allocation50_spill]] %s2704_s20  ;;  %p2160_p3 = por %p322_p1, %p321_p13 }
  0x9f   : > { %s228_s30 = ssub.s32 %s212_s13, %s226_s26  ;;  %s2611_s29 = sadd.s32 4294967294, %s1772_s25  }
  0xa0   : > { %s2609_s11 = scalar_select %p2160_p3, 1, 0 }
  0xa1   : > { %p328_p5 = scmp.eq.s32.totalorder %s2611_s29, 31  ;;  %s230_s1 = sor.u32 %s229_s3, %s228_s30 }
  0xa2   : > { %2610 = sst [smem:[#allocation46_spill]] %s2609_s11  ;;  %p231_p6 = scmp.eq.s32.totalorder %s230_s1, 0 }
  0xa3   : > { %p2168_p9 = por %p328_p5, %p327_p7  ;;  %p2176_p10 = pnand %p2556_p2, %p2054_p12 }
  0xa4   : > { %s2181_s16 = scalar_select %p231_p6, %s1720_s12, %s233_s21  }
  0xa5   : > { %s2612_s5 = scalar_select %p2168_p9, 1, 0 }
  0xa6   : > { %2615 = sst [smem:[#allocation52_spill]] %s2181_s16  ;;  %p240_p13 = scmp.ne.s32.totalorder %s1720_s12, %s2599_s8 }
  0xa7   : > { %2613 = sst [smem:[#allocation51_spill]] %s2612_s5  ;;  %s2548_s0 = sand.u32 1, %s2607_s10  }
  0xa8   : > { %s1235_s14 = scalar_select %p2054_p12, [#allocation5], [#allocation13] }
  0xa9   : > { %s1236_s13 = scalar_select %p2054_p12, %s1768_s24, 0 }
  0xaa   : > { %s2706_s14 = smov (!%p2556_p2, %s1235_s14), [#allocation19]  ;;  %p2199_p1 = por %p240_p13, %p129_p0 }
  0xab   : > { %s2708_s13 = smov (!%p2556_p2, %s1236_s13), 0  ;;  %s1180_s18 = sshll.u32 %s2548_s0, 7 }
  0xac   : > { %s362_s26 = sld [smem:[%s2706_s14 + %s2708_s13]]  ;;  %p2211_p7 = pnand %p2556_p2, %p2199_p1 }
  0xad   : > { %s1237_s3 = scalar_select %p2054_p12, [#allocation4], [#allocation14] }
  0xae   : > { %p1196_p5 = scmp.ge.s32.totalorder %s1772_s25, 1  ;;  %p504_p13 = scmp.lt.s32.totalorder %s1772_s25, 33 }
  0xaf   : > { %s2710_s3 = smov (!%p2556_p2, %s1237_s3), [#allocation20]  ;;  %s361_s17 = scalar_lea.vmem [#allocation6], %s1180_s18 }
  0xb0   : > { %s1245_s30 = scalar_select %p2199_p1, [#allocation5], [#allocation17] }
  0xb1   : > { %s1246_s1 = scalar_select %p2199_p1, %s1768_s24, 0 }
  0xb2   : > { %s1181_s8 = sadd.s32 4294967295, %s362_s26  ;;  %p363_p6 = scmp.lt.s32.totalorder %s1764_s23, %s362_s26 }
  0xb3   : > { %p365_p0 = scmp.lt.s32.totalorder %s1764_s23, %s1181_s8  ;;  %s2714_s30 = smov (!%p2556_p2, %s1245_s30), [#allocation23] }
  0xb4   : > { %s2718_s1 = smov (!%p2556_p2, %s1246_s1), 0  ;;  %s2619_s16 = sld [smem:[#allocation54_spill]] }
  0xb5   : > { %s366_s29 = scalar_select %p365_p0, %s1764_s23, %s1181_s8 }
  0xb6   : > { %p2236_p0 = pnand %p1196_p5, %p504_p13  ;;  %s2240_s26 = sld [smem:[%s2714_s30 + %s2718_s1]] }
  0xb7   : > { %s367_s14 = sshra.s32 %s366_s29, 7  ;;  %s372_s13 = sand.u32 127, %s366_s29 }
  0xb8   : > { %s369_s0 = sadd.s32 %s1768_s24, %s367_s14  ;;  %s2622_s1 = sand.u32 1, %s2607_s10  }
  0xb9   : > { %s1182_s6 = sshll.u32 %s369_s0, 7  ;;  %s2243_s0 = sshll.u32 %s361_s17, 4  ;;  %s385_s0 = int_to_ptr.vmem [resolvable:$true] %s2243_s0 }
  0xba   : > { %s373_s28 = sadd.s32 %s1182_s6, %s372_s13  ;;  %s2620_s5 = smov %s2619_s16 }
  0xbb   : > { %s2712_s28 = smov (!%p2054_p12, %s373_s28), 0  ;;  %s358_s17 = scalar_lea.sflag [#allocation7], %s2622_s1 }
  0xbc   : > { %s2716_s28 = smov (!%p2556_p2, %s2712_s28), 0  ;;  %s1523_s15 = scalar_lea.hbm %s2620_s5, 2048 }
  0xbd   : > { %s374_s8 = sld [smem:[%s2710_s3 + %s2716_s28]]  ;;  %s1191_s3 = sadd.s32 4294967295, %s2240_s26 }
  0xbe   : > { %s375_s6 = scalar_select %p363_p6, %s1760_s22, 1 }
  0xbf   : > { %p2253_p12 = scmp.lt.s32.totalorder %s1764_s23, %s1191_s3  ;;  %p1520_p6 = pneg %p2176_p10 }
  0xc3   : > { %s1183_s13 = sshll.u32 %s374_s8, 5 }
  0xc4   : > { %s379_s27 = sadd.s32 %s1183_s13, %s375_s6 }
  0xc5   : > { %s1184_s28 = sshll.u32 %s379_s27, 3 }
  0xc6   : > { %s381_s20 = scalar_lea.hbm %s2619_s16, %s1184_s28 }
  0xc7   : > { %s382_s18 = sshll.u32 %s381_s20, 4  ;;  %s383_s18 = int_to_ptr.hbm [resolvable:$true] %s382_s18 }
  0xc8   : > { %s1516_s11 = sshra.s32 %s383_s18, 4  ;;  %s1517_s11 = int_to_ptr.hbm [resolvable:$true] %s1516_s11 }
  0xc9   : > { %s1518_s14 = scalar_lea.hbm %s1517_s11, 128  ;;  %p1524_p9 = scmp.lt.s32.totalorder %s1517_s11, %s2620_s5 }
  0xca   : > { %p1519_p5 = scmp.ne.s32.totalorder %s1517_s11, %s1518_s14  ;;  %p1525_p3 = scmp.lt.s32.totalorder %s1523_s15, %s1518_s14 }
  0xcc   : > { %p1521_p13 = pnand %p1520_p6, %p1519_p5  ;;  %p1526_p4 = por %p1525_p3, %p1524_p9 }
  0xce   : > { %p1522_p2 = pneg %p1521_p13 }
  0xd0   : > { %p1527_p8 = pnand %p1526_p4, %p1522_p2 }
  0xd2   : > { %1530 = shalt.err (!%p1527_p8)
}
  0xd3   : > { %s2623_s20 = smov 8   ;;  %s2624_s10 = smov 128  }
  0xd4   : > { %s2625_s6 = smov 256   ;;  %p2627_p2 = scmp.lt.s32.totalorder %s1772_s25, 32 }
  0xd5   : > { %1262 = dma.hbm_to_vmem [thread:$0]  (!%p2176_p10), %s383_s18, 2048, %s385_s0, %s358_s17, %s2625_s6, %s2624_s10, %s2623_s20  }
  0xd6   : > { %s440_s11 = scalar_select %p2253_p12, %s1764_s23, %s1191_s3 }
  0xd7   : > { %s2626_s14 = scalar_select %p2199_p1, [#allocation4], [#allocation18] }
  0xd8   : > { %s441_s7 = sshra.s32 %s440_s11, 7  ;;  %s446_s13 = sand.u32 127, %s440_s11 }
  0xd9   : > { %s2720_s14 = smov (!%p2627_p2, %s2626_s14), [#allocation24]  ;;  %s443_s28 = sadd.s32 %s1768_s24, %s441_s7 }
  0xda   : > { %s1192_s1 = sshll.u32 %s443_s28, 7  ;;  %p437_p8 = scmp.lt.s32.totalorder %s1764_s23, %s2240_s26 }
  0xdb   : > { %s447_s27 = sadd.s32 %s1192_s1, %s446_s13  ;;  %s433_s8 = sand.u32 1, %s1720_s12  }
  0xdc   : > { %s2722_s27 = smov (!%p2199_p1, %s447_s27), 0  ;;  %p2628_p4 = pmov %p2627_p2 }
  0xdd   : > { %s449_s15 = scalar_select %p437_p8, %s1760_s22, 1 }
  0xde   : > { %s2724_s27 = smov (!%p2628_p4, %s2722_s27), 0  ;;  %s1190_s2 = sshll.u32 %s433_s8, 7 }
  0xdf   : > { %s448_s0 = sld [smem:[%s2720_s14 + %s2724_s27]]  ;;  %s1193_s3 = sshll.u32 %s449_s15, 4 }
  0xe0   : > { %s435_s18 = scalar_lea.vmem [#allocation11], %s1190_s2  ;;  %s2629_s28 = sld [smem:[#allocation56_spill]] }
  0xe1   : > { %s459_s17 = sshll.u32 %s435_s18, 4  ;;  %p1550_p9 = pneg %p2211_p7  ;;  %s460_s17 = int_to_ptr.vmem [resolvable:$true] %s459_s17 }
  0xe5   : > { %s1194_s30 = sshll.u32 %s448_s0, 5 }
  0xe6   : > { %s454_s16 = sadd.s32 %s1194_s30, %s1193_s3  ;;  %s1553_s8 = scalar_lea.hbm %s2629_s28, 2048 }
  0xe7   : > { %s1195_s6 = sshll.u32 %s454_s16, 3 }
  0xe8   : > { %s456_s26 = scalar_lea.hbm %s2629_s28, %s1195_s6 }
  0xe9   : > { %s457_s21 = sshll.u32 %s456_s26, 4  ;;  %s458_s21 = int_to_ptr.hbm [resolvable:$true] %s457_s21 }
  0xea   : > { %s1546_s13 = sshra.s32 %s458_s21, 4  ;;  %s1547_s13 = int_to_ptr.hbm [resolvable:$true] %s1546_s13 }
  0xeb   : > { %s1548_s1 = scalar_lea.hbm %s1547_s13, 128  ;;  %p1554_p12 = scmp.lt.s32.totalorder %s1547_s13, %s2629_s28 }
  0xec   : > { %p1549_p3 = scmp.ne.s32.totalorder %s1547_s13, %s1548_s1  ;;  %p1555_p5 = scmp.lt.s32.totalorder %s1553_s8, %s1548_s1 }
  0xee   : > { %p1551_p10 = pnand %p1550_p9, %p1549_p3  ;;  %p1556_p6 = por %p1555_p5, %p1554_p12 }
  0xf0   : > { %p1552_p1 = pneg %p1551_p10 }
  0xf2   : > { %p1557_p13 = pnand %p1556_p6, %p1552_p1 }
  0xf4   : > { %1560 = shalt.err (!%p1557_p13)
}
  0xf5   : > { %s2630_s0 = sld [smem:[#allocation42_spill]] }
  0xf6   : > { %s2631_s3 = sld [smem:[#allocation36_spill]] (!%p2236_p0) }
  0xf7   : > { %508 = sbr.rel (%p2236_p0) target bundleno = 729 (0x2d9), region = 40 }
  0xfb   : > { %1276 = dma.hbm_to_vmem [thread:$0]  (!%p2211_p7), %s458_s21, 2048, %s460_s17, %s2630_s0, %s2624_s10, %s2624_s10, %s2623_s20  }
  0xfc   : > { %s510_s18 = sand.u32 1, %s2631_s3  }
  0xfd   : > { %s1197_s16 = sshll.u32 %s510_s18, 7  ;;  %s511_s6 = scalar_lea.sflag [#allocation7], %s510_s18 }
  0xfe   : > { %s2309_s11 = scalar_lea.vmem [#allocation6], %s1197_s16 }
  0xff   : > { %1683 = dma.done.wait (%p2042_p11), %s511_s6, 2048  }
 0x100   : > { %1685 = vsyncadd (%p2042_p11), %s511_s6, 4294965248  ;;  %s2633_s19 = sld [smem:[#allocation34_spill]]  ;;  %s520_s26 = sand.u32 1, %s1971_s9  }
 0x101   : > { %s2634_s7 = sld [smem:[#allocation47_spill]]  ;;  %s521_s29 = scalar_lea.sflag [#allocation10], %s520_s26 }
 0x106   : > { %s522_s20 = sand.u32 1, %s2633_s19  }
 0x107   : > { %s1198_s10 = sshll.u32 %s522_s20, 7  ;;  %p2635_p7 = scmp.ne.s32.totalorder %s2634_s7, 0 }
 0x108   : > { %s2317_s17 = scalar_lea.vmem [#allocation9], %s1198_s10 }
 0x109   : > { %1687 = dma.done.wait (%p2635_p7), %s521_s29, 2048  }
 0x10a   : > { %1689 = vsyncadd (%p2635_p7), %s521_s29, 4294965248  ;;  %s2636_s21 = sld [smem:[#allocation33_spill]]  ;;  %p2637_p11 = scmp.ne.s32.totalorder %s2606_s4, 0 }
 0x110   : > { %s532_s13 = sand.u32 1, %s2636_s21  }
 0x111   : > { %s1199_s1 = sshll.u32 %s532_s13, 7 }
 0x112   : > { %s2324_s14 = scalar_lea.vmem [#allocation11], %s1199_s1 }
 0x113   : > { %1691 = dma.done.wait (%p2637_p11), %s521_s29, 2048  }
 0x114   : > { %1693 = vsyncadd (%p2637_p11), %s521_s29, 4294965248  ;;  %s2638_s9 = sld [smem:[#allocation40_spill]] }
 0x115   : > { %s2639_s27 = sld [smem:[#allocation31_spill]] }
 0x116   : > { %s2640_s8 = sld [smem:[#allocation39_spill]] }
 0x117   : > { %s2641_s15 = sld [smem:[#allocation38_spill]] }
 0x118   : > { %s2642_s6 = sld [smem:[#allocation53_spill]] }
 0x11a   : > { %s1201_s2 = sshll.u32 %s2638_s9, 2  ;;  %s647_s3 = sld [smem:[#allocation5 + %s2638_s9]] }
 0x11b   : > { %s2560_s0 = sand.u32 1, %s2639_s27   ;;  %p599_p0 = scmp.lt.s32.totalorder %s1201_s2, 7 }
 0x11c   : > { %s1200_s30 = sshll.u32 %s2560_s0, 5  ;;  %p682_p2 = scmp.eq.s32.totalorder %s2640_s8, 0 }
 0x11d   : > { %s2726_s2 = smov (!%p599_p0, %s1201_s2), 7  ;;  %p683_p8 = scmp.eq.s32.totalorder %s2641_s15, 0 }
 0x11e   : > { %s1202_s4 = sshll.u32 %s2726_s2, 3  ;;  %s2354_s5 = scalar_lea.vmem [#allocation12], %s1200_s30 }
 0x11f   : > { %s2340_s19 = scalar_lea.vmem %s2642_s6, %s1202_s4  ;;  %p2342_p4 = pnand %p683_p8, %p682_p2 }
 0x120   : > { %s1203_s26 = sadd.s32 4294967295, %s647_s3  ;;  %s2644_s6 = sld [smem:[#allocation57_spill]] }
 0x121   : > { %p649_p3 = scmp.lt.s32.totalorder %s2640_s8, %s1203_s26 }
 0x123   : > { %s2728_s8 = smov (!%p649_p3, %s2640_s8), %s1203_s26 }
 0x124   : > { %s651_s20 = sshra.s32 %s2728_s8, 7  ;;  %s656_s10 = sand.u32 127, %s2728_s8 }
 0x125   : > { %s653_s29 = sadd.s32 %s2638_s9, %s651_s20 }
 0x126   : > { %s1204_s21 = sshll.u32 %s653_s29, 7 }
 0x127   : > { %s657_s13 = sadd.s32 %s1204_s21, %s656_s10 }
 0x128   : > { %s658_s1 = sld [smem:[#allocation4 + %s657_s13]] }
 0x12e   : > { %p660_p9 = scmp.lt.s32.totalorder %s658_s1, 7 }
 0x130   : > { %s2730_s1 = smov (!%p660_p9, %s658_s1), 7  ;;  %687 = sbr.rel (%p2342_p4) target bundleno = 314 (0x13a), region = 56 }
 0x131   : > { %s1206_s27 = sshll.u32 %s2730_s1, 3 }
 0x132   : > { %s665_s15 = sadd.s32 %s1206_s27, %s2726_s2 }
 0x133   : > { %s1207_s18 = sshll.u32 %s665_s15, 3 }
 0x134   : > { %s2352_s0 = scalar_lea.vmem %s2644_s6, %s1207_s18 }
 0x135   : > { %v1779_v0 = vmov 0.0  }
 0x136   : > { %688 = vst [vmem:[#allocation2 + $0x10] sm:$0xff] %v1779_v0 }
 0x137   : > { %689 = vst [vmem:[#allocation2] sm:$0xff] %v1779_v0 }
 0x138   : > { %690 = vst [vmem:[#allocation2 + $0x18] sm:$0xff] %v1779_v0 }
 0x139   : > { %691 = vst [vmem:[#allocation2 + $0x8] sm:$0xff] %v1779_v0 }
 0x13a PF: > { %s2645_s9 = sld [smem:[#allocation40_spill]] }
 0x13b   : > { %s2646_s2 = sld [smem:[#allocation39_spill]] }
 0x140   : > { %s692_s8 = sld [smem:[#allocation5 + %s2645_s9]] }
 0x146   : > { %p1208_p10 = scmp.ge.s32.totalorder %s2646_s2, %s692_s8 }
 0x148   : > { %696 = sbr.rel (%p1208_p10) target bundleno = 684 (0x2ac), region = 60 }
 0x14d   : > { %v716_v1 = vld [vmem:[%s2309_s11 + $0x78] sm:$0xff]  ;;  %v715_v2 = vld [vmem:[%s2309_s11 + $0x70] sm:$0xff]  ;;  %v714_v3 = vld [vmem:[%s2309_s11 + $0x68] sm:$0xff]  ;;  %v1780_v20 = vmov 0  }
 0x14e   : > { %717 = vmatpush.msra.mxu0 %v716_v1  ;;  %1219 = vmatpush.msra.mxu3 %v716_v1  ;;  %v713_v4 = vld [vmem:[%s2309_s11 + $0x60] sm:$0xff]  ;;  %v761_v5 = vld [vmem:[%s2317_s17 + $0x78] sm:$0xff]  ;;  %v760_v6 = vld [vmem:[%s2317_s17 + $0x70] sm:$0xff] }
 0x14f   : > { %v712_v7 = vld [vmem:[%s2309_s11 + $0x58] sm:$0xff]  ;;  %762 = vmatpush.msra.mxu1 %v761_v5  ;;  %v759_v8 = vld [vmem:[%s2317_s17 + $0x68] sm:$0xff]  ;;  %v711_v9 = vld [vmem:[%s2309_s11 + $0x50] sm:$0xff]  ;;  %1444 = vset.pattern.permute.xlu0 %v1780_v20 }
 0x150   : > { %718 = vmatpush.msra.mxu0 %v715_v2  ;;  %1220 = vmatpush.msra.mxu3 %v715_v2  ;;  %v758_v10 = vld [vmem:[%s2317_s17 + $0x60] sm:$0xff]  ;;  %v710_v11 = vld [vmem:[%s2309_s11 + $0x48] sm:$0xff]  ;;  %v757_v12 = vld [vmem:[%s2317_s17 + $0x58] sm:$0xff] }
 0x151   : > { %763 = vmatpush.msra.mxu1 %v760_v6  ;;  %v709_v13 = vld [vmem:[%s2309_s11 + $0x40] sm:$0xff]  ;;  %v756_v14 = vld [vmem:[%s2317_s17 + $0x50] sm:$0xff]  ;;  %v708_v15 = vld [vmem:[%s2309_s11 + $0x38] sm:$0xff]  ;;  %1445 = vset.pattern.permute.xlu1 %v1780_v20 }
 0x152   : > { %719 = vmatpush.msra.mxu0 %v714_v3  ;;  %1221 = vmatpush.msra.mxu3 %v714_v3  ;;  %v755_v16 = vld [vmem:[%s2317_s17 + $0x48] sm:$0xff]  ;;  %v707_v17 = vld [vmem:[%s2309_s11 + $0x30] sm:$0xff]  ;;  %v754_v18 = vld [vmem:[%s2317_s17 + $0x40] sm:$0xff] }
 0x153   : > { %764 = vmatpush.msra.mxu1 %v759_v8  ;;  %v706_v19 = vld [vmem:[%s2309_s11 + $0x28] sm:$0xff]  ;;  %v875_v21 = vld [vmem:[%s2352_s0] sm:$0xff]  ;;  %v753_v22 = vld [vmem:[%s2317_s17 + $0x38] sm:$0xff] }
 0x154   : > { %720 = vmatpush.msra.mxu0 %v713_v4  ;;  %1222 = vmatpush.msra.mxu3 %v713_v4  ;;  %v705_v23 = vld [vmem:[%s2309_s11 + $0x20] sm:$0xff]  ;;  %v752_v24 = vld [vmem:[%s2317_s17 + $0x30] sm:$0xff]  ;;  %v704_v25 = vld [vmem:[%s2309_s11 + $0x18] sm:$0xff] }
 0x155   : > { %765 = vmatpush.msra.mxu1 %v758_v10  ;;  %881 = vperm.xlu0 %1444, %v875_v21   ;;  %v877_v26 = vld [vmem:[%s2352_s0 + $0x10] sm:$0xff]  ;;  %v751_v27 = vld [vmem:[%s2317_s17 + $0x28] sm:$0xff]  ;;  %v750_v29 = vld [vmem:[%s2317_s17 + $0x20] sm:$0xff] }
 0x156   : > { %721 = vmatpush.msra.mxu0 %v712_v7  ;;  %1223 = vmatpush.msra.mxu3 %v712_v7  ;;  %v703_v28 = vld [vmem:[%s2309_s11 + $0x10] sm:$0xff]  ;;  %v876_v30 = vld [vmem:[%s2352_s0 + $0x8] sm:$0xff]  ;;  %v749_v32 = vld [vmem:[%s2317_s17 + $0x18] sm:$0xff] }
 0x157   : > { %766 = vmatpush.msra.mxu1 %v757_v12  ;;  %891 = vperm.xlu1 %1445, %v877_v26   ;;  %v702_v31 = vld [vmem:[%s2309_s11 + $0x8] sm:$0xff]  ;;  %v701_v33 = vld [vmem:[%s2309_s11] sm:$0xff]  ;;  %v748_v36 = vld [vmem:[%s2317_s17 + $0x10] sm:$0xff] }
 0x158   : > { %722 = vmatpush.msra.mxu0 %v711_v9  ;;  %1224 = vmatpush.msra.mxu3 %v711_v9  ;;  %v697_v34 = vld [vmem:[%s2340_s19] sm:$0xff]  ;;  %v698_v35 = vld [vmem:[%s2340_s19 + $0x8] sm:$0xff]  ;;  %v878_v37 = vld [vmem:[%s2352_s0 + $0x18] sm:$0xff] }
 0x159   : > { %767 = vmatpush.msra.mxu1 %v756_v14  ;;  %v747_v38 = vld [vmem:[%s2317_s17 + $0x8] sm:$0xff]  ;;  %v746_v39 = vld [vmem:[%s2317_s17] sm:$0xff]  ;;  %v699_v40 = vld [vmem:[%s2340_s19 + $0x10] sm:$0xff] }
 0x15a   : > { %723 = vmatpush.msra.mxu0 %v710_v11  ;;  %1225 = vmatpush.msra.mxu3 %v710_v11  ;;  %v700_v41 = vld [vmem:[%s2340_s19 + $0x18] sm:$0xff]  ;;  %v921_v43 = vld [vmem:[%s2324_s14 + $0x70] sm:$0xff]  ;;  %v920_v44 = vld [vmem:[%s2324_s14 + $0x68] sm:$0xff] }
 0x15b   : > { %768 = vmatpush.msra.mxu1 %v755_v16  ;;  %v922_v42 = vld [vmem:[%s2324_s14 + $0x78] sm:$0xff]  ;;  %v919_v45 = vld [vmem:[%s2324_s14 + $0x60] sm:$0xff]  ;;  %v917_v47 = vld [vmem:[%s2324_s14 + $0x50] sm:$0xff] }
 0x15c   : > { %724 = vmatpush.msra.mxu0 %v709_v13  ;;  %1226 = vmatpush.msra.mxu3 %v709_v13  ;;  %v918_v46 = vld [vmem:[%s2324_s14 + $0x58] sm:$0xff]  ;;  %v916_v48 = vld [vmem:[%s2324_s14 + $0x48] sm:$0xff]  ;;  %v915_v49 = vld [vmem:[%s2324_s14 + $0x40] sm:$0xff] }
 0x15d   : > { %769 = vmatpush.msra.mxu1 %v754_v18  ;;  %886 = vperm.xlu0 %1444, %v876_v30   ;;  %v914_v50 = vld [vmem:[%s2324_s14 + $0x38] sm:$0xff]  ;;  %v913_v51 = vld [vmem:[%s2324_s14 + $0x30] sm:$0xff]  ;;  %v912_v52 = vld [vmem:[%s2324_s14 + $0x28] sm:$0xff] }
 0x15e   : > { %725 = vmatpush.msra.mxu0 %v708_v15  ;;  %1227 = vmatpush.msra.mxu3 %v708_v15  ;;  %v911_v53 = vld [vmem:[%s2324_s14 + $0x20] sm:$0xff]  ;;  %v910_v54 = vld [vmem:[%s2324_s14 + $0x18] sm:$0xff]  ;;  %v909_v55 = vld [vmem:[%s2324_s14 + $0x10] sm:$0xff] }
 0x15f   : > { %770 = vmatpush.msra.mxu1 %v753_v22  ;;  %896 = vperm.xlu1 %1445, %v878_v37   ;;  %v908_v56 = vld [vmem:[%s2324_s14 + $0x8] sm:$0xff]  ;;  %v907_v59 = vld [vmem:[%s2324_s14] sm:$0xff] }
 0x160   : > { %726 = vmatpush.msra.mxu0 %v707_v17  ;;  %1228 = vmatpush.msra.mxu3 %v707_v17 }
 0x161   : > { %771 = vmatpush.msra.mxu1 %v752_v24  ;;  %923 = vmatpush.msra.mxu2 %v922_v42 }
 0x162   : > { %727 = vmatpush.msra.mxu0 %v706_v19  ;;  %1229 = vmatpush.msra.mxu3 %v706_v19 }
 0x163   : > { %772 = vmatpush.msra.mxu1 %v751_v27  ;;  %924 = vmatpush.msra.mxu2 %v921_v43 }
 0x164   : > { %728 = vmatpush.msra.mxu0 %v705_v23  ;;  %1230 = vmatpush.msra.mxu3 %v705_v23 }
 0x165   : > { %773 = vmatpush.msra.mxu1 %v750_v29  ;;  %925 = vmatpush.msra.mxu2 %v920_v44 }
 0x166   : > { %729 = vmatpush.msra.mxu0 %v704_v25  ;;  %1231 = vmatpush.msra.mxu3 %v704_v25 }
 0x167   : > { %774 = vmatpush.msra.mxu1 %v749_v32  ;;  %926 = vmatpush.msra.mxu2 %v919_v45 }
 0x168   : > { %730 = vmatpush.msra.mxu0 %v703_v28  ;;  %1232 = vmatpush.msra.mxu3 %v703_v28 }
 0x169   : > { %775 = vmatpush.msra.mxu1 %v748_v36  ;;  %927 = vmatpush.msra.mxu2 %v918_v46 }
 0x16a   : > { %731 = vmatpush.msra.mxu0 %v702_v31  ;;  %1233 = vmatpush.msra.mxu3 %v702_v31 }
 0x16b   : > { %776 = vmatpush.msra.mxu1 %v747_v38  ;;  %928 = vmatpush.msra.mxu2 %v917_v47 }
 0x16c   : > { %732 = vmatpush.msra.mxu0 %v701_v33  ;;  %1234 = vmatpush.msra.mxu3 %v701_v33 }
 0x16d   : > { %733 = vmatmul.f32.vlgmr.msra.gmra.mxu0 %v697_v34  ;;  %736 = vmatmul.f32.vlgmr.msra.gmra.mxu3 %v698_v35 }
 0x16e   : > { %777 = vmatpush.msra.mxu1 %v746_v39  ;;  %929 = vmatpush.msra.mxu2 %v916_v48 }
 0x16f   : > { %778 = vmatmul.f32.vlgmr.msra.gmra.mxu1 %v697_v34 }
 0x170   : > { %930 = vmatpush.msra.mxu2 %v915_v49 }
 0x172   : > { %931 = vmatpush.msra.mxu2 %v914_v50 }
 0x174   : > { %932 = vmatpush.msra.mxu2 %v913_v51 }
 0x175   : > { %739 = vmatmul.f32.gmra.mxu3 %v699_v40 }
 0x176   : > { %933 = vmatpush.msra.mxu2 %v912_v52 }
 0x177   : > { %781 = vmatmul.f32.gmra.mxu1 %v698_v35 }
 0x178   : > { %934 = vmatpush.msra.mxu2 %v911_v53 }
 0x17a   : > { %935 = vmatpush.msra.mxu2 %v910_v54 }
 0x17c   : > { %936 = vmatpush.msra.mxu2 %v909_v55 }
 0x17d   : > { %742 = vmatmul.f32.gmra.mxu3 %v700_v41 }
 0x17e   : > { %937 = vmatpush.msra.mxu2 %v908_v56 }
 0x17f   : > { %784 = vmatmul.f32.gmra.mxu1 %v699_v40 }
 0x180   : > { %938 = vmatpush.msra.mxu2 %v907_v59 }
 0x187   : > { %787 = vmatmul.f32.gmra.mxu1 %v700_v41 }
 0x1c7   : > { %v882_v26 = vpop.permute.xlu0 %881 }
 0x1c9   : > { %v892_v59 = vpop.permute.xlu1 %891 }
 0x1cf   : > { %v887_v47 = vpop.permute.xlu0 %886 }
 0x1ea   : > { %v734_v57 = vpop.f32.mrf.mxu0 }
 0x1eb   : > { %v1209_v58 = vmul.f32 -1.442695, %v734_v57 }
 0x1ec   : > { %v779_v6 = vpop.f32.mrf.mxu1 }
 0x1ed   : > { %1446 = vpow2.f32 %v1209_v58 }
 0x1f0   : > { %v737_v60 = vpop.f32.mrf.mxu3 }
 0x1f1   : > { %v1210_v61 = vmul.f32 -1.442695, %v737_v60 }
 0x1f3   : > { %v1447_v62 = vpop.eup %1446  ;;  %1448 = vpow2.f32 %v1210_v61 }
 0x1f4   : > { %v803_v63 = vadd.f32 1.0, %v1447_v62  ;;  %v782_v27 = vpop.f32.mrf.mxu1 }
 0x1f6   : > { %1450 = vrcp.f32 %v803_v63  ;;  %v818_v8 = vand.u32 2147483648, %v803_v63  ;;  %v816_v12 = vand.u32 2147483647, %v803_v63  ;;  %vm812_vm1 = vweird.f32 %v803_v63 }
 0x1f8   : > { %v2416_v0 = vpop.f32.mrf.mxu3  ;;  %v819_v18 = vor.u32 1.1754944e-38, %v818_v8  ;;  %vm817_vm3 = vcmp.eq.f32.partialorder %v816_v12, 8.507059e+37 }
 0x1f9   : > { %v1449_v1 = vpop.eup %1448  ;;  %v1211_v2 = vmul.f32 -1.442695, %v2416_v0 }
 0x1fa   : > { %v804_v3 = vadd.f32 1.0, %v1449_v1 }
 0x1fb   : > { %1452 = vpow2.f32 %v1211_v2 }
 0x1fc   : > { %v1451_v4 = vpop.eup %1450  ;;  %1454 = vrcp.f32 %v804_v3  ;;  %v833_v22 = vand.u32 2147483648, %v804_v3  ;;  %v831_v25 = vand.u32 2147483647, %v804_v3  ;;  %vm827_vm5 = vweird.f32 %v804_v3  ;;  %v785_v48 = vpop.f32.mrf.mxu1 }
 0x1fd   : > { %v808_v5 = vmul.f32 %v1451_v4, %v803_v63  ;;  %vm813_vm0 = vweird.f32 %v1451_v4 }
 0x1fe   : > { %vm814_vm2 = vmor %vm812_vm1, %vm813_vm0  ;;  %v834_v32 = vor.u32 1.1754944e-38, %v833_v22  ;;  %vm832_vm7 = vcmp.eq.f32.partialorder %v831_v25, 8.507059e+37 }
 0x1ff   : > { %v809_v7 = vsub.f32 1.0, %v808_v5 }
 0x200   : > { %v2419_v9 = vpop.f32.mrf.mxu3 }
 0x201   : > { %v1453_v10 = vpop.eup %1452  ;;  %v810_v11 = vmul.f32 %v1451_v4, %v809_v7  ;;  %v1212_v13 = vmul.f32 -1.442695, %v2419_v9 }
 0x202   : > { %v1455_v14 = vpop.eup %1454  ;;  %v805_v15 = vadd.f32 1.0, %v1453_v10  ;;  %v904_v10 = vld [vmem:[#allocation2] sm:$0xff] }
 0x203   : > { %v811_v16 = vadd.f32 %v1451_v4, %v810_v11  ;;  %v823_v17 = vmul.f32 %v1455_v14, %v804_v3  ;;  %1456 = vpow2.f32 %v1212_v13  ;;  %vm828_vm4 = vweird.f32 %v1455_v14  ;;  %v905_v13 = vld [vmem:[#allocation2 + $0x18] sm:$0xff] }
 0x204   : > { %1458 = vrcp.f32 %v805_v15  ;;  %vm829_vm6 = vmor %vm827_vm5, %vm828_vm4  ;;  %v848_v40 = vand.u32 2147483648, %v805_v15  ;;  %v846_v42 = vand.u32 2147483647, %v805_v15  ;;  %vm842_vm9 = vweird.f32 %v805_v15  ;;  %v788_v2 = vpop.f32.mrf.mxu1 }
 0x205   : > { %v815_v19 = vsel %vm814_vm2, %v1451_v4, %v811_v16  ;;  %v824_v20 = vsub.f32 1.0, %v823_v17  ;;  %v897_v4 = vpop.permute.xlu1 %896  ;;  %v906_v16 = vld [vmem:[#allocation2 + $0x8] sm:$0xff] }
 0x206   : > { %v820_v21 = vsel %vm817_vm3, %v819_v18, %v815_v19  ;;  %v849_v46 = vor.u32 1.1754944e-38, %v848_v40  ;;  %vm847_vm11 = vcmp.eq.f32.partialorder %v846_v42, 8.507059e+37 }
 0x207   : > { %v867_v23 = vmul.f32 %v820_v21, %v734_v57  ;;  %v825_v24 = vmul.f32 %v1455_v14, %v824_v20 }
 0x209   : > { %v1457_v28 = vpop.eup %1456  ;;  %v826_v29 = vadd.f32 %v1455_v14, %v825_v24  ;;  %v871_v30 = vmul.f32 %v867_v23, %v779_v6  ;;  %v903_v6 = vld [vmem:[#allocation2 + $0x10] sm:$0xff] }
 0x20a   : > { %v1459_v31 = vpop.eup %1458  ;;  %v806_v33 = vadd.f32 1.0, %v1457_v28 }
 0x20b   : > { %v830_v34 = vsel %vm829_vm6, %v1455_v14, %v826_v29  ;;  %v838_v35 = vmul.f32 %v1459_v31, %v805_v15  ;;  %v899_v36 = vmul.f32 %v882_v26, %v871_v30  ;;  %vm843_vm8 = vweird.f32 %v1459_v31 }
 0x20c   : > { %v835_v37 = vsel %vm832_vm7, %v834_v32, %v830_v34  ;;  %1460 = vrcp.f32 %v806_v33  ;;  %vm844_vm10 = vmor %vm842_vm9, %vm843_vm8  ;;  %v863_v55 = vand.u32 2147483648, %v806_v33  ;;  %v861_v57 = vand.u32 2147483647, %v806_v33 }
 0x20d   : > { %v868_v38 = vmul.f32 %v835_v37, %v737_v60  ;;  %v839_v39 = vsub.f32 1.0, %v838_v35  ;;  %939 = vmatmul.f32.vlgmr.msra.gmra.mxu2 %v899_v36  ;;  %vm857_vm13 = vweird.f32 %v806_v33 }
 0x20e   : > { %v864_v61 = vor.u32 1.1754944e-38, %v863_v55  ;;  %vm862_vm15 = vcmp.eq.f32.partialorder %v861_v57, 8.507059e+37 }
 0x20f   : > { %v840_v41 = vmul.f32 %v1459_v31, %v839_v39  ;;  %v872_v43 = vmul.f32 %v868_v38, %v782_v27 }
 0x211   : > { %v841_v44 = vadd.f32 %v1459_v31, %v840_v41  ;;  %v900_v51 = vmul.f32 %v887_v47, %v872_v43 }
 0x212   : > { %v1461_v45 = vpop.eup %1460 }
 0x213   : > { %v845_v49 = vsel %vm844_vm10, %v1459_v31, %v841_v44  ;;  %v853_v50 = vmul.f32 %v1461_v45, %v806_v33  ;;  %vm858_vm12 = vweird.f32 %v1461_v45 }
 0x214   : > { %v850_v52 = vsel %vm847_vm11, %v849_v46, %v845_v49  ;;  %vm859_vm14 = vmor %vm857_vm13, %vm858_vm12 }
 0x215   : > { %v869_v53 = vmul.f32 %v850_v52, %v2416_v0  ;;  %v854_v54 = vsub.f32 1.0, %v853_v50  ;;  %942 = vmatmul.f32.gmra.mxu2 %v900_v51 }
 0x217   : > { %v855_v56 = vmul.f32 %v1461_v45, %v854_v54  ;;  %v873_v58 = vmul.f32 %v869_v53, %v785_v48 }
 0x219   : > { %v856_v60 = vadd.f32 %v1461_v45, %v855_v56  ;;  %v901_v63 = vmul.f32 %v892_v59, %v873_v58 }
 0x21b   : > { %v860_v62 = vsel %vm859_vm14, %v1461_v45, %v856_v60 }
 0x21c   : > { %v865_v1 = vsel %vm862_vm15, %v864_v61, %v860_v62 }
 0x21d   : > { %v870_v3 = vmul.f32 %v865_v1, %v2419_v9  ;;  %945 = vmatmul.f32.gmra.mxu2 %v901_v63 }
 0x21f   : > { %v874_v0 = vmul.f32 %v870_v3, %v788_v2 }
 0x221   : > { %v902_v5 = vmul.f32 %v897_v4, %v874_v0 }
 0x225   : > { %948 = vmatmul.f32.gmra.mxu2 %v902_v5 }
 0x290   : > { %v940_v7 = vpop.f32.mrf.mxu2 }
 0x291   : > { %v952_v8 = vadd.f32 %v940_v7, %v903_v6 }
 0x293   : > { %956 = vst [vmem:[#allocation2 + $0x10] sm:$0xff] %v952_v8 }
 0x298   : > { %v943_v11 = vpop.f32.mrf.mxu2 }
 0x299   : > { %v953_v12 = vadd.f32 %v943_v11, %v904_v10 }
 0x29b   : > { %957 = vst [vmem:[#allocation2] sm:$0xff] %v953_v12 }
 0x2a0   : > { %v946_v14 = vpop.f32.mrf.mxu2 }
 0x2a1   : > { %v954_v15 = vadd.f32 %v946_v14, %v905_v13 }
 0x2a3   : > { %958 = vst [vmem:[#allocation2 + $0x18] sm:$0xff] %v954_v15 }
 0x2a8   : > { %v949_v17 = vpop.f32.mrf.mxu2 }
 0x2a9   : > { %v955_v9 = vadd.f32 %v949_v17, %v906_v16 }
 0x2ab   : > { %959 = vst [vmem:[#allocation2 + $0x8] sm:$0xff] %v955_v9 }
 0x2ac PF: > { %s2647_s11 = sld [smem:[#allocation39_spill]] }
 0x2ad   : > { %s2648_s17 = sld [smem:[#allocation38_spill]] }
 0x2b2   : > { %p960_p1 = scmp.eq.s32.totalorder %s2647_s11, 7 }
 0x2b3   : > { %p961_p12 = scmp.eq.s32.totalorder %s2648_s17, 1 }
 0x2b5   : > { %p962_p5 = pnand %p961_p12, %p960_p1 }
 0x2b7   : > { %965 = sbr.rel (%p962_p5) target bundleno = 705 (0x2c1), region = 64 }
 0x2bc   : > { %v966_v18 = vld [vmem:[#allocation2 + $0x10] sm:$0xff]  ;;  %v967_v19 = vld [vmem:[#allocation2] sm:$0xff]  ;;  %v968_v20 = vld [vmem:[#allocation2 + $0x18] sm:$0xff] }
 0x2bd   : > { %970 = vst [vmem:[%s2354_s5] sm:$0xff] %v966_v18  ;;  %v969_v21 = vld [vmem:[#allocation2 + $0x8] sm:$0xff] }
 0x2be   : > { %971 = vst [vmem:[%s2354_s5 + $0x8] sm:$0xff] %v967_v19 }
 0x2bf   : > { %972 = vst [vmem:[%s2354_s5 + $0x10] sm:$0xff] %v968_v20 }
 0x2c0   : > { %973 = vst [vmem:[%s2354_s5 + $0x18] sm:$0xff] %v969_v21 }
 0x2c1 PF: > { %s2649_s14 = sld [smem:[#allocation40_spill]]  ;;  %s987_s10 = sshll.u32 %s2354_s5, 4  ;;  %s988_s10 = int_to_ptr.vmem [resolvable:$true] %s987_s10 }
 0x2c2   : > { %s2650_s0 = sld [smem:[#allocation31_spill]] }
 0x2c3   : > { %s2651_s3 = sld [smem:[#allocation46_spill]] }
 0x2c4   : > { %s2652_s26 = sld [smem:[#allocation58_spill]] }
 0x2c7   : > { %s1218_s30 = sshll.u32 %s2649_s14, 5 }
 0x2c8   : > { %s2653_s21 = sand.u32 1, %s2650_s0  }
 0x2c9   : > { %s975_s13 = scalar_lea.sflag [#allocation8], %s2653_s21  ;;  %p2654_p13 = scmp.ne.s32.totalorder %s2651_s3, 0 }
 0x2ca   : > { %s986_s20 = scalar_lea.hbm %s2652_s26, %s1218_s30  ;;  %s1596_s4 = scalar_lea.hbm %s2652_s26, 64 }
 0x2cb   : > { %s989_s29 = sshll.u32 %s986_s20, 4  ;;  %s990_s29 = int_to_ptr.hbm [resolvable:$true] %s989_s29 }
 0x2cc   : > { %s1590_s1 = sshra.s32 %s990_s29, 4  ;;  %s1591_s1 = int_to_ptr.hbm [resolvable:$true] %s1590_s1 }
 0x2cd   : > { %s1592_s27 = scalar_lea.hbm %s1591_s1, 32  ;;  %p1597_p0 = scmp.lt.s32.totalorder %s1591_s1, %s2652_s26 }
 0x2ce   : > { %p1593_p6 = scmp.ne.s32.totalorder %s1591_s1, %s1592_s27  ;;  %p1598_p2 = scmp.lt.s32.totalorder %s1596_s4, %s1592_s27 }
 0x2d0   : > { %p1594_p7 = pnand %p1593_p6, %p2654_p13  ;;  %p1599_p8 = por %p1598_p2, %p1597_p0 }
 0x2d2   : > { %p1595_p11 = pneg %p1594_p7 }
 0x2d4   : > { %p1600_p4 = pnand %p1599_p8, %p1595_p11 }
 0x2d6   : > { %1603 = shalt.err (!%p1600_p4)
}
 0x2d7   : > { %s1781_s5 = smov 128   ;;  %s1782_s9 = smov 8  }
 0x2d8   : > { %1253 = dma.vmem_to_hbm [thread:$0]  (%p2654_p13), %s988_s10, 512, %s990_s29, %s975_s13, %s1781_s5, %s1781_s5, %s1782_s9  }
 0x2d9 PF: > { %s2655_s8 = sld [smem:[#allocation30_spill]]  ;;  %p1282_p3 = scmp.ge.s32.totalorder %s1772_s25, 2 }
 0x2da   : > { %s2656_s2 = sld [smem:[#allocation51_spill]] }
 0x2df   : > { %s1004_s11 = sand.u32 1, %s2655_s8  }
 0x2e0   : > { %p2657_p9 = scmp.ne.s32.totalorder %s2656_s2, 0  ;;  %s1005_s17 = scalar_lea.sflag [#allocation8], %s1004_s11 }
 0x2e2   : > { %p1278_p10 = pnand %p1282_p3, %p2657_p9 }
 0x2e4   : > { %p1279_p1 = pneg %p1278_p10 }
 0x2e6   : > { %1695 = dma.done.wait (%p1279_p1), %s1005_s17, 512  }
 0x2e7   : > { %1697 = vsyncadd (%p1279_p1), %s1005_s17, 4294966784  ;;  %s39_s25 = sadd.s32 1, %s1772_s25   ;;  %s2659_s0 = sld [smem:[#allocation31_spill]] }
 0x2e8   : > { %p2452_p12 = scmp.ge.s32.totalorder %s39_s25, 34   ;;  %s2660_s9 = sld [smem:[#allocation32_spill]] }
 0x2e9   : > { %s2661_s1 = sld [smem:[#allocation50_spill]]  ;;  %s2674_s11 = smov %s1720_s12 }
 0x2ea   : > { %s2662_s10 = sld [smem:[#allocation33_spill]]  ;;  %s2677_s19 = smov %s1760_s22 }
 0x2eb   : > { %s2663_s3 = sld [smem:[#allocation52_spill]]  ;;  %s2678_s20 = smov %s1764_s23 }
 0x2ec   : > { %s2664_s13 = sld [smem:[#allocation34_spill]]  ;;  %s2679_s21 = smov %s1768_s24 }
 0x2ed   : > { %s2665_s30 = sld [smem:[#allocation35_spill]] }
 0x2ee   : > { %s2666_s15 = sld [smem:[#allocation49_spill]] }
 0x2ef   : > { %s2667_s16 = sld [smem:[#allocation36_spill]] }
 0x2f0   : > { %s2668_s17 = sld [smem:[#allocation37_spill]] }
 0x2f1   : > { %s2669_s18 = sld [smem:[#allocation48_spill]]  ;;  %s2675_s12 = smov %s2663_s3 }
 0x2f2   : > { %s2670_s7 = sld [smem:[#allocation43_spill]] }
 0x2f3   : > { %s2671_s29 = sld [smem:[#allocation44_spill]]  ;;  %s2676_s14 = smov %s2665_s30 }
 0x2f4   : > { %s2672_s27 = sld [smem:[#allocation45_spill]] }
 0x2f6   :  { %38 = sbr.rel (!%p2452_p12) target bundleno = 27 (0x1b), region = 127 }
 0x2f8   : > { %s2680_s22 = smov %s2670_s7 }
 0x2f9   : > { %s2681_s23 = smov %s2671_s29 }
 0x2fa   : > { %s2682_s24 = smov %s2672_s27 }
 0x2fb   :  { %1011 = vsyncpa [#allocation7], 1 }
 0x2fc   :  { %1013 = vsyncpa [#allocation7 + $0x1], 1 }
 0x2fd   :  { %1014 = vsyncpa [#allocation10], 1 }
 0x2fe   :  { %1016 = vsyncpa [#allocation10 + $0x1], 1 }
 0x2ff   :  { %1017 = vsyncpa [#allocation8], 1 }
 0x300   :  { %1019 = vsyncpa [#allocation8 + $0x1], 1 }

</bundles_post_ra>
